<compile_context>
chip_gen: v7x
topology: tpu7x:2x2x1
jax: 0.10.0
libtpu: 0.0.40
codegen_flags: <defaults>
</compile_context>

<pallas_src>
import jax
import jax.numpy as jnp
from jax.experimental import pallas as pl
from jax.experimental.pallas import tpu as pltpu


_VMEM_BUDGET_BYTES = 24 * 1024 * 1024  # requested scoped VMEM: above v5e's 16 MiB
                                        # default, below ~24-28 MiB v7x guidance.


def _round_up(x: int, m: int) -> int:
    return ((x + m - 1) // m) * m


def _resident_spec(shape):
    """Constant-index block: stays VMEM-resident across the whole grid.

    Single-buffered when supported (double buffers are pointless for blocks
    whose index_map never changes).
    """
    index_map = lambda i: (0, 0)
    try:
        return pl.BlockSpec(shape, index_map, pipeline_mode=pl.Buffered(1))
    except Exception:  # older JAX without pipeline_mode / Buffered
        return pl.BlockSpec(shape, index_map)


def _choose_batch_tile(B: int, H: int, A: int, max_batch_tile: int) -> int:
    """Pick the lane (batch) tile.

    - B <= 256: one exact block (block dims equal to array dims are always
      legal; no lane padding, grid of 1).
    - otherwise: multiple of 128 (lane alignment), capped by (a) max_batch_tile,
      (b) a VMEM budget (the (H, TB) hidden activation dominates), and
      (c) ceil(B/2) so the grid keeps >= 2 steps and both v7x TensorCores get
      work via the "parallel" batch axis.
    """
    if B <= 256:
        return B
    # Per lane column (f32 bytes): x block (D -> 8 sublanes, double-buffered),
    # out block (A -> 8, double-buffered), hidden activation H, ~3 small temps.
    per_lane_bytes = 4 * (2 * 8 + 2 * 8 + H + 3 * max(A, 8))
    vmem_cap = (_VMEM_BUDGET_BYTES // 2) // per_lane_bytes  # ~2x headroom
    tile = min(max_batch_tile, max(vmem_cap, 128), _round_up(pl.cdiv(B, 2), 128))
    return max(128, (tile // 128) * 128)


def policy_kernel(xt_ref, w1_ref, b1_ref, w2_ref, b2_ref, ot_ref):
    # fc1: (H, D) @ (D, TB) + (H, 1), ReLU.  Batch is on lanes, so every VPU /
    # EUP op and the streamed DMAs are lane-dense.  MXU shape (K=4, N=2) is
    # intentionally left alone: the MXU slot is not the bottleneck here.
    h = jnp.dot(w1_ref[...], xt_ref[...], preferred_element_type=jnp.float32)
    h = jnp.maximum(h + b1_ref[...], 0.0)

    # fc2: (A, H) @ (H, TB) + (A, 1).
    logits = jnp.dot(w2_ref[...], h, preferred_element_type=jnp.float32)
    logits = logits + b2_ref[...]

    # Numerically stable softmax over the action (sublane) axis.  Exact divide
    # (not approx reciprocal) so every column sums to 1 to fp32 precision —
    # downstream REINFORCE sampling / log-probs rely on it.
    m = jnp.max(logits, axis=0, keepdims=True)
    e = jnp.exp(logits - m)
    denom = jnp.sum(e, axis=0, keepdims=True)
    ot_ref[...] = (e / denom).astype(ot_ref.dtype)


def policy_forward_t(x_t, w1, b1, w2, b2, *, max_batch_tile=16384):
    """Batch-on-lanes entry point (preferred: lane-dense DMAs and stores).

    x_t : (state_dim, B) f32      -- batch on the minor (lane) axis
    w1  : (hidden, state_dim) f32 -- torch fc1.weight layout
    b1  : (hidden, 1) f32
    w2  : (num_actions, hidden) f32 -- torch fc2.weight layout
    b2  : (num_actions, 1) f32
    returns (num_actions, B) f32 action probabilities (each column sums to 1).
    """
    D, B = x_t.shape
    H = w1.shape[0]
    A = w2.shape[0]

    TB = _choose_batch_tile(B, H, A, max_batch_tile)
    grid = (pl.cdiv(B, TB),)  # ragged last block -> masked writeback, no padding copies

    return pl.pallas_call(
        policy_kernel,
        out_shape=jax.ShapeDtypeStruct((A, B), jnp.float32),
        grid=grid,
        in_specs=[
            pl.BlockSpec((D, TB), lambda i: (0, i)),   # x^T: streamed, lane-dense
            _resident_spec((H, D)),                    # w1: VMEM-resident
            _resident_spec((H, 1)),                    # b1
            _resident_spec((A, H)),                    # w2
            _resident_spec((A, 1)),                    # b2
        ],
        out_specs=pl.BlockSpec((A, TB), lambda i: (0, i)),  # lane-dense output slab
        compiler_params=pltpu.CompilerParams(
            dimension_semantics=("parallel",),   # batch axis across v7x's 2 TCs
            vmem_limit_bytes=_VMEM_BUDGET_BYTES,
        ),
    )(x_t, w1, b1, w2, b2)


def policy_forward(x, w1, b1, w2, b2, *, max_batch_tile=16384):
    """Torch-semantics wrapper: x (B, state_dim) or (state_dim,) -> (B, num_actions).

    Matches Policy.forward (a 1-D input is unsqueezed, so it returns
    (1, num_actions)).  This wrapper transposes x / the result to bridge the
    row-major torch layout to the kernel's lane-dense layout; callers that can
    keep the batch on the minor axis should call policy_forward_t directly and
    skip both transposes.
    """
    if x.ndim == 1:
        x = x[None, :]
    x = x.reshape(x.shape[0], -1)  # torch: x.view(B, -1)
    probs_t = policy_forward_t(x.T, w1, b1, w2, b2, max_batch_tile=max_batch_tile)
    return probs_t.T


def init_policy_params(key, state_dim, hidden_size, num_actions):
    """torch.nn.Linear-style U(-1/sqrt(fan_in), 1/sqrt(fan_in)) init, torch layout."""
    k1, k2, k3, k4 = jax.random.split(key, 4)
    bound1 = 1.0 / float(state_dim) ** 0.5
    bound2 = 1.0 / float(hidden_size) ** 0.5
    w1 = jax.random.uniform(k1, (hidden_size, state_dim), jnp.float32, -bound1, bound1)
    b1 = jax.random.uniform(k2, (hidden_size, 1), jnp.float32, -bound1, bound1)
    w2 = jax.random.uniform(k3, (num_actions, hidden_size), jnp.float32, -bound2, bound2)
    b2 = jax.random.uniform(k4, (num_actions, 1), jnp.float32, -bound2, bound2)
    return w1, b1, w2, b2


def _ref_forward(x, w1, b1, w2, b2):
    if x.ndim == 1:
        x = x[None, :]
    h = jnp.maximum(x @ w1.T + b1[:, 0], 0.0)
    return jax.nn.softmax(h @ w2.T + b2[:, 0], axis=-1)


if __name__ == "__main__":
    # Small, CartPole-like configuration: state_dim=4, 2 discrete actions.
    state_dim, hidden_size, num_actions = 4, 32, 2

    key = jax.random.PRNGKey(0)
    k_x, k_x2, k_x3, k_p = jax.random.split(key, 4)
    w1, b1, w2, b2 = init_policy_params(k_p, state_dim, hidden_size, num_actions)

    # 1) tiny batch (typical per-env-step usage): single exact block, grid=(1,).
    x = jax.random.normal(k_x, (2, state_dim), jnp.float32)
    probs = jax.block_until_ready(policy_forward(x, w1, b1, w2, b2))
    ref = _ref_forward(x, w1, b1, w2, b2)
    assert probs.shape == (2, num_actions)
    assert jnp.allclose(probs, ref, atol=1e-3, rtol=1e-3)
    assert jnp.allclose(jnp.sum(probs, axis=-1), 1.0, atol=1e-3)

    # 2) unbatched (state_dim,) input -> (1, num_actions), like the torch module.
    x1 = jax.random.normal(k_x3, (state_dim,), jnp.float32)
    probs1 = jax.block_until_ready(policy_forward(x1, w1, b1, w2, b2))
    assert probs1.shape == (1, num_actions)
    assert jnp.allclose(probs1, _ref_forward(x1, w1, b1, w2, b2), atol=1e-3, rtol=1e-3)

    # 3) larger, non-tile-aligned batch: grid of 2 (TB=256) with a ragged last
    #    block -- exercises the masked-writeback path (no pad/slice copies).
    x2 = jax.random.normal(k_x2, (300, state_dim), jnp.float32)
    probs2 = jax.block_until_ready(policy_forward(x2, w1, b1, w2, b2))
    ref2 = _ref_forward(x2, w1, b1, w2, b2)
    assert probs2.shape == (300, num_actions)
    assert jnp.allclose(probs2, ref2, atol=1e-3, rtol=1e-3)
    assert jnp.allclose(jnp.sum(probs2, axis=-1), 1.0, atol=1e-3)

    print("KERNEL_OK")
</pallas_src>

<mosaic_0001>
module attributes {stable_mosaic.version = 11 : i64} {
  func.func @policy_kernel(%arg0: i32, %arg1: memref<4x2xf32, #tpu.memory_space<vmem>>, %arg2: memref<32x4xf32, #tpu.memory_space<vmem>>, %arg3: memref<32x1xf32, #tpu.memory_space<vmem>>, %arg4: memref<2x32xf32, #tpu.memory_space<vmem>>, %arg5: memref<2x1xf32, #tpu.memory_space<vmem>>, %arg6: memref<2x2xf32, #tpu.memory_space<vmem>>) attributes {dimension_semantics = [#tpu.dimension_semantics<parallel>], iteration_bounds = array<i64: 1>, scalar_prefetch = 0 : i64, scratch_operands = 0 : i64, tpu.core_type = #tpu.core_type<tc>, window_params = [{transform_indices = @transform_0, window_bounds = array<i64: 4, 2>}, {pipeline_mode = #tpu.pipeline_mode<synchronous>, transform_indices = @transform_1, window_bounds = array<i64: 32, 4>}, {pipeline_mode = #tpu.pipeline_mode<synchronous>, transform_indices = @transform_2, window_bounds = array<i64: 32, 1>}, {pipeline_mode = #tpu.pipeline_mode<synchronous>, transform_indices = @transform_3, window_bounds = array<i64: 2, 32>}, {pipeline_mode = #tpu.pipeline_mode<synchronous>, transform_indices = @transform_4, window_bounds = array<i64: 2, 1>}, {transform_indices = @transform_5, window_bounds = array<i64: 2, 2>}]} {
    %c0 = arith.constant 0 : index
    %c0_0 = arith.constant 0 : index
    %0 = vector.load %arg2[%c0, %c0_0] : memref<32x4xf32, #tpu.memory_space<vmem>>, vector<32x4xf32>
    %c0_1 = arith.constant 0 : index
    %c0_2 = arith.constant 0 : index
    %1 = vector.load %arg1[%c0_1, %c0_2] : memref<4x2xf32, #tpu.memory_space<vmem>>, vector<4x2xf32>
    %cst = arith.constant dense<0.000000e+00> : vector<32x2xf32>
    %2 = tpu.matmul %0, %1, %cst {dimension_numbers = #tpu.dot_dimension_numbers<[1], [0], [0], [1], [0, 0, 1, 1], [], []>} : vector<32x4xf32>, vector<4x2xf32>, vector<32x2xf32> -> vector<32x2xf32>
    %c0_3 = arith.constant 0 : index
    %c0_4 = arith.constant 0 : index
    %3 = vector.load %arg3[%c0_3, %c0_4] : memref<32x1xf32, #tpu.memory_space<vmem>>, vector<32x1xf32>
    %4 = vector.broadcast %3 : vector<32x1xf32> to vector<32x2xf32>
    %5 = arith.addf %2, %4 : vector<32x2xf32>
    %cst_5 = arith.constant 0.000000e+00 : f32
    %6 = vector.broadcast %cst_5 : f32 to vector<32x2xf32>
    %7 = arith.maximumf %5, %6 : vector<32x2xf32>
    %c0_6 = arith.constant 0 : index
    %c0_7 = arith.constant 0 : index
    %8 = vector.load %arg4[%c0_6, %c0_7] : memref<2x32xf32, #tpu.memory_space<vmem>>, vector<2x32xf32>
    %cst_8 = arith.constant dense<0.000000e+00> : vector<2x2xf32>
    %9 = tpu.matmul %8, %7, %cst_8 {dimension_numbers = #tpu.dot_dimension_numbers<[1], [0], [0], [1], [0, 0, 1, 1], [], []>} : vector<2x32xf32>, vector<32x2xf32>, vector<2x2xf32> -> vector<2x2xf32>
    %c0_9 = arith.constant 0 : index
    %c0_10 = arith.constant 0 : index
    %10 = vector.load %arg5[%c0_9, %c0_10] : memref<2x1xf32, #tpu.memory_space<vmem>>, vector<2x1xf32>
    %11 = vector.broadcast %10 : vector<2x1xf32> to vector<2x2xf32>
    %12 = arith.addf %9, %11 : vector<2x2xf32>
    %cst_11 = arith.constant dense<0xFF800000> : vector<2xf32>
    %13 = vector.multi_reduction <maximumf>, %12, %cst_11 [0] : vector<2x2xf32> to vector<2xf32>
    %14 = vector.shape_cast %13 : vector<2xf32> to vector<1x2xf32>
    %15 = vector.broadcast %14 : vector<1x2xf32> to vector<2x2xf32>
    %16 = arith.subf %12, %15 : vector<2x2xf32>
    %17 = math.exp %16 : vector<2x2xf32>
    %cst_12 = arith.constant dense<0.000000e+00> : vector<2xf32>
    %18 = vector.multi_reduction <add>, %17, %cst_12 [0] : vector<2x2xf32> to vector<2xf32>
    %19 = vector.shape_cast %18 : vector<2xf32> to vector<1x2xf32>
    %20 = vector.broadcast %19 : vector<1x2xf32> to vector<2x2xf32>
    %21 = arith.divf %17, %20 : vector<2x2xf32>
    %c0_13 = arith.constant 0 : index
    %c0_14 = arith.constant 0 : index
    %22 = vector.load %arg6[%c0_13, %c0_14] : memref<2x2xf32, #tpu.memory_space<vmem>>, vector<2x2xf32>
    tpu.vector_store %arg6[%c0_13, %c0_14], %21 {strides = array<i32>} : memref<2x2xf32, #tpu.memory_space<vmem>>, vector<2x2xf32>,
    return
  }
  func.func @transform_0(%arg0: i32) -> (i32, i32) {
    %c0_i32 = arith.constant 0 : i32
    %c0_i32_0 = arith.constant 0 : i32
    return %c0_i32, %arg0 : i32, i32
  }
  func.func @transform_1(%arg0: i32) -> (i32, i32) {
    %c0_i32 = arith.constant 0 : i32
    %c0_i32_0 = arith.constant 0 : i32
    %c0_i32_1 = arith.constant 0 : i32
    return %c0_i32, %c0_i32_0 : i32, i32
  }
  func.func @transform_2(%arg0: i32) -> (i32, i32) {
    %c0_i32 = arith.constant 0 : i32
    %c0_i32_0 = arith.constant 0 : i32
    %c0_i32_1 = arith.constant 0 : i32
    return %c0_i32, %c0_i32_0 : i32, i32
  }
  func.func @transform_3(%arg0: i32) -> (i32, i32) {
    %c0_i32 = arith.constant 0 : i32
    %c0_i32_0 = arith.constant 0 : i32
    %c0_i32_1 = arith.constant 0 : i32
    return %c0_i32, %c0_i32_0 : i32, i32
  }
  func.func @transform_4(%arg0: i32) -> (i32, i32) {
    %c0_i32 = arith.constant 0 : i32
    %c0_i32_0 = arith.constant 0 : i32
    %c0_i32_1 = arith.constant 0 : i32
    return %c0_i32, %c0_i32_0 : i32, i32
  }
  func.func @transform_5(%arg0: i32) -> (i32, i32) {
    %c0_i32 = arith.constant 0 : i32
    %c0_i32_0 = arith.constant 0 : i32
    return %c0_i32, %arg0 : i32, i32
  }
}

</mosaic_0001>

<bundles_post_ra>
// kernel: tpu_custom_call.1
= control target key start
LH: loop header
LB: loop body
LE: loop exit
PB: predicated region body
PF: predicated region fallthrough
CT: control target
= control target key end

     0   :  { %vm63_vm0 = vcmask 1043456   ;;  %vm50_vm1 = vcmask 31744   ;;  %v348_v5 = vmov 0   ;;  %s435_s0 = inlined_call_operand.vmem [shape: f32[4,2], index: 0, kind: input, shape index: {}]   ;;  %s436_s1 = inlined_call_operand.vmem [shape: f32[32,4], index: 1, kind: input, shape index: {}]   ;;  %s437_s2 = inlined_call_operand.vmem [shape: f32[32,1], index: 2, kind: input, shape index: {}]   ;;  %s438_s3 = inlined_call_operand.vmem [shape: f32[2,32], index: 3, kind: input, shape index: {}]   ;;  %s439_s4 = inlined_call_operand.vmem [shape: f32[2,1], index: 4, kind: input, shape index: {}]   ;;  %s440_s5 = inlined_call_operand.hbm [shape: f32[2,2], index: 5, kind: output, shape index: {}]  }
   0x1   :  { %v25_v0 = vld [vmem:[%s435_s0] sm:$0xf]  ;;  %v22_v2 = vld [vmem:[%s436_s1 + $0x8] sm:$0xff]  ;;  %v23_v3 = vld [vmem:[%s436_s1 + $0x10] sm:$0xff]  ;;  %318 = vset.pattern.permute.xlu0 %v348_v5 }
   0x2   :  { %v21_v1 = vld [vmem:[%s436_s1] sm:$0xff]  ;;  %288 = vmatprep.subr.msk.mxu0 %vm63_vm0, %v25_v0  ;;  %v28_v6 = vld [vmem:[%s437_s2 + $0x10] sm:$0xff] }
   0x3   :  { %290 = vmatprep.mubr.msk.f32.mxu0 %vm50_vm1, %v21_v1  ;;  %v26_v4 = vld [vmem:[%s437_s2] sm:$0xff]  ;;  %289 = vmatpush3.msk.msra.mxu0 %vm63_vm0, %v25_v0 }
   0x4   :  { %291 = vmatmul.mubr.msk.f32.vlgmr.msra.gmra.mrb[0].mxu0 %vm50_vm1, %v22_v2  ;;  %32 = vperm.xlu0 %318, %v26_v4  }
   0x5   :  { %10 = vsyncpa [#allocation3], 0  ;;  %293 = vmatprep.mubr.msk.f32.mxu0 %vm50_vm1, %v23_v3  ;;  %v24_v7 = vld [vmem:[%s436_s1 + $0x18] sm:$0xff]  ;;  %v27_v8 = vld [vmem:[%s437_s2 + $0x8] sm:$0xff]  ;;  %319 = vset.pattern.permute.xlu1 %v348_v5  ;;  %v349_v11 = vmov 0.0|0.0   ;;  %vm350_vm2 = vmmov 0  }
   0x6   :  { %42 = vperm.xlu1 %319, %v28_v6   ;;  %v29_v9 = vld [vmem:[%s437_s2 + $0x18] sm:$0xff]  ;;  %v157_v10 = vld [vmem:[%s439_s4] sm:$0x3]  ;;  %307 = vmatprep.subr.bf16.mxu1 %v349_v11  ;;  %v351_v12 = vmov 0.0   ;;  %vm163_vm3 = vcmask 261120   ;;  %vm237_vm4 = vcmask 9216  }
   0x7   :  { %304 = vmatprep.mubr.msk.f32.mxu1 %vm350_vm2, %v351_v12  ;;  %v156_v31 = vld [vmem:[%s438_s3] sm:$0x3]  ;;  %s352_s3 = smov [#allocation2]  }
   0x8   :  { %294 = vmatmul.mubr.msk.f32.gmra.mrb[2].mxu0 %vm50_vm1, %v24_v7  ;;  %37 = vperm.xlu0 %318, %v27_v8   ;;  %s264_s4 = sshll.u32 %s352_s3, 4  ;;  %s265_s4 = int_to_ptr.vmem [resolvable:$true] %s264_s4 }
   0x9   :  { %s324_s12 = scalar_lea.vmem %s265_s4, 32  ;;  %p329_p1 = scmp.lt.s32.totalorder %s265_s4, %s265_s4 }
   0xa   :  { %47 = vperm.xlu1 %319, %v29_v9   ;;  %p325_p0 = scmp.ne.s32.totalorder %s265_s4, %s324_s12  ;;  %p330_p2 = scmp.lt.s32.totalorder %s324_s12, %s324_s12 }
   0xc   :  { %160 = vperm.xlu0 %318, %v157_v10   ;;  %p331_p3 = por %p330_p2, %p329_p1 }
   0xe   :  { %p332_p4 = pnand %p331_p3, %p325_p0 }
  0x83   :  { %v33_v13 = vpop.permute.xlu0 %32 }
  0x85   :  { %v43_v14 = vpop.permute.xlu1 %42 }
  0x87   :  { %v38_v15 = vpop.permute.xlu0 %37 }
  0x89   :  { %v48_v21 = vpop.permute.xlu1 %47 }
  0x8b   :  { %v161_v32 = vpop.permute.xlu0 %160 }
  0xd7   :  { %v292_v16 = vpop.f32.mrb[0].mxu0 }
  0xd8   :  { %v139_v17 = vadd.f32 %v292_v16, %v38_v15  ;;  %v133_v18 = vpop.f32.mrb[1].mxu0 }
  0xd9   :  { %v134_v19 = vadd.f32 %v133_v18, %v33_v13 }
  0xda   :  { %v153_v20 = vmax.f32 %v139_v17, 0.0 }
  0xdb   :  { %v152_v22 = vmax.f32 %v134_v19, 0.0  ;;  %v295_v23 = vpop.f32.mrb[2].mxu0 }
  0xdc   :  { %v149_v24 = vadd.f32 %v295_v23, %v48_v21  ;;  %v143_v25 = vpop.f32.mrb[3].mxu0 }
  0xdd   :  { %v144_v26 = vadd.f32 %v143_v25, %v43_v14  ;;  %v308_v27 = vpack.c.bf16 %v153_v20, %v152_v22 }
  0xde   :  { %v155_v28 = vmax.f32 %v149_v24, 0.0 }
  0xdf   :  { %v154_v29 = vmax.f32 %v144_v26, 0.0  ;;  %309 = vmatpush3.bf16.msra.mxu1 %v308_v27 }
  0xe0   :  { %310 = vmatprep.subr.bf16.mxu1 %v349_v11 }
  0xe1   :  { %v311_v30 = vpack.c.bf16 %v155_v28, %v154_v29 }
  0xe3   :  { %312 = vmatpush3.bf16.msra.mxu1 %v311_v30 }
  0xe6   :  { %305 = vmatmul.mubr.msk.f32.vlgmr.msra.gmra.mrb[0].mxu1 %vm163_vm3, %v156_v31 }
 0x1b9   :  { %v233_v33 = vpop.f32.mrb[0].mxu1 }
 0x1ba   :  { %v234_v34 = vadd.f32 %v233_v33, %v161_v32  ;;  %v306_v35 = vpop.f32.mrb[1].mxu1 }
 0x1bc   :  { %v238_v36 = vsel %vm237_vm4, %v234_v34, -inf }
 0x1bd   :  { %v239_v37 = vrot.slane %v238_v36, 4 }
 0x1bf   :  { %v240_v38 = vmax.f32 %v238_v36, %v239_v37 }
 0x1c1   :  { %v241_v39 = vrot.slane %v240_v38, 2 }
 0x1c3   :  { %v242_v40 = vmax.f32 %v240_v38, %v241_v39 }
 0x1c5   :  { %v243_v41 = vrot.slane %v242_v40, 1 }
 0x1c7   :  { %v244_v42 = vmax.f32 %v242_v40, %v243_v41 }
 0x1c9   :  { %v245_v43 = vsub.f32 %v234_v34, %v244_v42 }
 0x1cb   :  { %v246_v44 = vmul.f32 1.442695, %v245_v43 }
 0x1cd   :  { %320 = vpow2.f32 %v246_v44 }
 0x1d7   :  { %v321_v45 = vpop.eup %320 }
 0x1d8   :  { %v248_v46 = vsel %vm237_vm4, %v321_v45, 0.0 }
 0x1d9   :  { %v249_v47 = vrot.slane %v248_v46, 4 }
 0x1db   :  { %v250_v48 = vadd.f32 %v249_v47, %v248_v46 }
 0x1dd   :  { %v251_v49 = vrot.slane %v250_v48, 2 }
 0x1df   :  { %v252_v50 = vadd.f32 %v251_v49, %v250_v48 }
 0x1e1   :  { %v253_v51 = vrot.slane %v252_v50, 1 }
 0x1e3   :  { %v254_v52 = vadd.f32 %v253_v51, %v252_v50 }
 0x1e5   :  { %322 = vrcp.f32 %v254_v52 }
 0x1ef   :  { %v323_v53 = vpop.eup %322 }
 0x1f0   :  { %v256_v54 = vmul.f32 %v323_v53, %v321_v45 }
 0x1f2   :  { %257 = vst.msk [vmem:[#allocation2] sm:$0x3] %vm237_vm4, %v256_v54 }
 0x1f3   :  { %335 = shalt.err (!%p332_p4)
}
 0x1f4   :  { %s336_s15 = scalar_lea.hbm %s440_s5, 32 }
 0x1f5   :  { %p337_p5 = scmp.ne.s32.totalorder %s440_s5, %s336_s15  ;;  %p340_p6 = scmp.lt.u32.totalorder %s336_s15, %s440_s5 }
 0x1f7   :  { %p342_p7 = pnand %p340_p6, %p337_p5 }
 0x1f9   :  { %345 = shalt.err (!%p342_p7)
}
 0x1fa   :  { %267 = dma.vmem_to_hbm [thread:$0]  %s265_s4, 32, %s440_s5, [#allocation3]  }
 0x1fb   :  { %346 = dma.done.wait [#allocation3], 32  }
 0x1fc   :  { %347 = vsyncadd [#allocation3], 4294967264 }
 0x1fd   :  { %271 = vsyncpa [#allocation3], 1 }

</bundles_post_ra>
